<compile_context>
chip_gen: v5e
topology: v5e:2x2
jax: 0.10.0
libtpu: 0.0.40
codegen_flags: <defaults>
</compile_context>

<pallas_src>
import functools
import math

import jax
import jax.numpy as jnp
from jax import lax
from jax.experimental import pallas as pl
from jax.experimental.pallas import tpu as pltpu

LEAKY_64 = 1.0 / 64.0   # activation slope inside Conv (act=True)
LEAKY_01 = 0.1          # activation slope after the BatchNorm in BottleneckCSP
BN_EPS = 1e-5


def _cdiv(a, b):
    return -(-a // b)


def _round_up(x, m):
    return _cdiv(x, m) * m


def _pick_tm(m, cap=2048):
    # Big tiles amortize the ~0.35us per-grid-step overhead. When m exceeds the
    # cap, balance the tiles so a "slightly over cap" m doesn't double the work
    # (e.g. m=1030 -> tm=520, grid=2; not tm=1024, m_pad=2048).
    m8 = _round_up(max(m, 8), 8)
    if m8 <= cap:
        return m8
    steps = _cdiv(m8, cap)
    return _round_up(_cdiv(m8, steps), 8)


def _compiler_params(dim_sem, vmem_need_bytes):
    # Raise the scoped-VMEM limit when tiles are big, but keep >=16 MiB headroom
    # below v7x's 64 MiB physical VMEM (Mosaic internal scratch, semaphores,
    # double-buffered outputs).
    limit = int(min(max(vmem_need_bytes + (16 << 20), 32 << 20), 48 << 20))
    return pltpu.CompilerParams(
        dimension_semantics=tuple(dim_sem),
        vmem_limit_bytes=limit,
    )


def _leaky(x, slope):
    return jnp.where(x >= 0.0, x, x * slope)


# ----------------------------------------------------------------------------
# head: cv1 (1x1 + LeakyReLU(1/64)) and cv2 (plain 1x1, BN scale pre-folded),
# computed as ONE matmul against the lane-concatenated (c1, 2c_) weight.
# ----------------------------------------------------------------------------
def _csp_head_kernel(x_ref, w12_ref, y1_ref, y2_ref):
    c_ = y1_ref.shape[-1]
    acc = jnp.dot(x_ref[...], w12_ref[...], preferred_element_type=jnp.float32)
    y1_ref[...] = _leaky(acc[:, :c_], LEAKY_64).astype(y1_ref.dtype)
    y2_ref[...] = acc[:, c_:].astype(y2_ref.dtype)          # cv2 has no act


def _csp_head(x2d, w12, c_):
    m, c1 = x2d.shape
    tm = _pick_tm(m)
    grid = (_cdiv(m, tm),)
    itm = jnp.dtype(x2d.dtype).itemsize
    need = ((2 * tm * c1 + 4 * tm * c_) * itm         # x + two outputs (dbl-buf)
            + 2 * c1 * 2 * c_ * itm                   # concatenated weight
            + tm * 2 * c_ * 4)                        # f32 accumulator
    return pl.pallas_call(
        _csp_head_kernel,
        out_shape=(jax.ShapeDtypeStruct((m, c_), x2d.dtype),
                   jax.ShapeDtypeStruct((m, c_), x2d.dtype)),
        grid_spec=pltpu.PrefetchScalarGridSpec(
            num_scalar_prefetch=0,
            grid=grid,
            in_specs=[
                pl.BlockSpec((tm, c1), lambda i: (i, 0)),
                pl.BlockSpec((c1, 2 * c_), lambda i: (0, 0)),
            ],
            out_specs=[
                pl.BlockSpec((tm, c_), lambda i: (i, 0)),
                pl.BlockSpec((tm, c_), lambda i: (i, 0)),
            ],
        ),
        compiler_params=_compiler_params(("parallel",), need),
    )(x2d, w12)


# ----------------------------------------------------------------------------
# Fused Bottleneck chain: all nb blocks in one pallas_call.
# Grid (n, nb); the padded activation slab stays resident in VMEM scratch
# across the nb axis, output is written back to HBM only on the last block.
# Per block: 1x1 conv + LeakyReLU(1/64), 3x3 conv (single big-K matmul over the
# in-VMEM tap slab) + LeakyReLU(1/64), optional residual.
# ----------------------------------------------------------------------------
def _bottleneck_chain_kernel(add_residual, x_ref, w1_ref, w2_ref, o_ref,
                             slab_ref):
    j = pl.program_id(1)
    hp, wp, c = slab_ref.shape
    _, h, w, _ = o_ref.shape
    cmid = w1_ref.shape[-1]

    # Initialize the zero-padded slab once per image (border stays zero since
    # only the interior is ever rewritten).
    @pl.when(j == 0)
    def _():
        slab_ref[...] = jnp.zeros(slab_ref.shape, slab_ref.dtype)
        slab_ref[1:1 + h, 1:1 + w, :] = x_ref[0]

    xp = slab_ref[...]                                           # (hp, wp, c)

    # Bottleneck.cv1: 1x1 conv + LeakyReLU(1/64) on the padded slab. The zero
    # border maps to exactly zero (bias-free conv, leaky(0)==0), which is the
    # zero padding the 3x3 conv needs.
    # TODO(synk): restrict this matmul to the interior rows/cols to skip the
    # ~(2hp+2wp) padded rows of wasted MXU work.
    a = jnp.dot(xp.reshape(hp * wp, c), w1_ref[0],
                preferred_element_type=jnp.float32)
    hmid = _leaky(a, LEAKY_64).astype(xp.dtype).reshape(hp, wp, cmid)

    # Bottleneck.cv2: 3x3 conv as ONE K=9*cmid matmul. The tap slab is built
    # from 9 shifted views of hmid entirely in VMEM (no im2col touches HBM).
    taps = [hmid[ki:ki + h, kj:kj + w, :]
            for ki in range(3) for kj in range(3)]
    tap_slab = jnp.concatenate(taps, axis=-1).reshape(h * w, 9 * cmid)
    acc = jnp.dot(tap_slab, w2_ref[0], preferred_element_type=jnp.float32)
    y = _leaky(acc, LEAKY_64).reshape(h, w, c)

    if add_residual:                  # shortcut and c1 == c2 inside the chain
        y = y + xp[1:1 + h, 1:1 + w, :].astype(jnp.float32)

    ynew = y.astype(slab_ref.dtype)
    slab_ref[1:1 + h, 1:1 + w, :] = ynew        # feed the next block (VMEM only)

    @pl.when(j == pl.num_programs(1) - 1)
    def _():
        o_ref[0] = ynew.astype(o_ref.dtype)     # single HBM writeback per image


def _bottleneck_chain(h_nhwc, w1_stack, w2_stack, shortcut=True):
    n, h, w, c = h_nhwc.shape
    nb, _, cmid = w1_stack.shape
    hp = h + 2
    # Align the padded width to a multiple of 8 so the in-kernel reshape
    # (hp, wp, c) -> (hp*wp, c) is a layout no-op; the extra right-padding
    # columns stay zero and are never read by the taps.
    wp = _round_up(w + 2, 8)

    itm = jnp.dtype(h_nhwc.dtype).itemsize
    need = (hp * wp * c * itm                        # resident slab scratch
            + 4 * h * w * c * itm                    # x in + out (dbl-buffered)
            + 2 * (c * cmid + 9 * cmid * c) * itm    # stacked weights (dbl-buf)
            + hp * wp * cmid * (4 + itm)             # f32 1x1 temp + bf16 hmid
            + h * w * 9 * cmid * itm                 # tap slab
            + h * w * c * 8)                         # f32 acc + residual temp
    # TODO(synk): for feature maps too large for VMEM (v7x: 64 MiB/TC) or for
    # n==1 on v7x, row-tile the image with a 1-row halo (manual DMA) so both
    # TensorCores get work; the current layout holds one whole padded image.
    return pl.pallas_call(
        functools.partial(_bottleneck_chain_kernel, shortcut),
        out_shape=jax.ShapeDtypeStruct((n, h, w, c), h_nhwc.dtype),
        grid_spec=pltpu.PrefetchScalarGridSpec(
            num_scalar_prefetch=0,
            grid=(n, nb),
            in_specs=[
                pl.BlockSpec((1, h, w, c), lambda b, j: (b, 0, 0, 0)),
                pl.BlockSpec((1, c, cmid), lambda b, j: (j, 0, 0)),
                pl.BlockSpec((1, 9 * cmid, c), lambda b, j: (j, 0, 0)),
            ],
            out_specs=pl.BlockSpec((1, h, w, c), lambda b, j: (b, 0, 0, 0)),
            scratch_shapes=[pltpu.VMEM((hp, wp, c), h_nhwc.dtype)],
        ),
        compiler_params=_compiler_params(("parallel", "arbitrary"), need),
    )(h_nhwc, w1_stack, w2_stack)


# ----------------------------------------------------------------------------
# tail: cv3 (BN scale folded into weight) + shift + LeakyReLU(0.1)
#       + cv4 + LeakyReLU(1/64).  Channel concat folded into cv4's matmul.
# ----------------------------------------------------------------------------
def _csp_tail_kernel(m_ref, y2_ref, w3_ref, b1_ref, b2_ref, w4_ref, o_ref):
    c_ = m_ref.shape[-1]
    # y1 = cv3(m) with BN scale pre-folded into w3 columns
    y1 = jnp.dot(m_ref[...], w3_ref[...], preferred_element_type=jnp.float32)
    z1 = _leaky(y1 + b1_ref[...], LEAKY_01)
    # y2 already carries its BN scale (folded into cv2's weight in the head)
    z2 = _leaky(y2_ref[...].astype(jnp.float32) + b2_ref[...], LEAKY_01)

    wdt = w4_ref.dtype
    if c_ % 128 == 0:
        # lane-aligned halves: one K=2c_ matmul over the concatenated activation
        z = jnp.concatenate([z1, z2], axis=-1).astype(wdt)
        acc = jnp.dot(z, w4_ref[...], preferred_element_type=jnp.float32)
    else:
        w4 = w4_ref[...]
        acc = jnp.dot(z1.astype(wdt), w4[:c_], preferred_element_type=jnp.float32)
        acc = acc + jnp.dot(z2.astype(wdt), w4[c_:],
                            preferred_element_type=jnp.float32)
    o_ref[...] = _leaky(acc, LEAKY_64).astype(o_ref.dtype)


def _csp_tail(m2d, y2_2d, w3s, b1, b2, w4, out_dtype):
    mm, c_ = m2d.shape
    c2 = w4.shape[1]
    tm = _pick_tm(mm)
    grid = (_cdiv(mm, tm),)
    itm = jnp.dtype(m2d.dtype).itemsize
    need = ((4 * tm * c_ + 2 * tm * c2) * itm              # m, y2, out (dbl-buf)
            + (2 * c_ * c_ + 2 * 2 * c_ * c2) * itm        # w3, w4
            + 16 * c_                                      # shifts
            + tm * 2 * c_ * 4 + tm * c2 * 4)               # f32 z1/z2 + acc
    return pl.pallas_call(
        _csp_tail_kernel,
        out_shape=jax.ShapeDtypeStruct((mm, c2), out_dtype),
        grid_spec=pltpu.PrefetchScalarGridSpec(
            num_scalar_prefetch=0,
            grid=grid,
            in_specs=[
                pl.BlockSpec((tm, c_), lambda i: (i, 0)),
                pl.BlockSpec((tm, c_), lambda i: (i, 0)),
                pl.BlockSpec((c_, c_), lambda i: (0, 0)),
                pl.BlockSpec((1, c_), lambda i: (0, 0)),
                pl.BlockSpec((1, c_), lambda i: (0, 0)),
                pl.BlockSpec((2 * c_, c2), lambda i: (0, 0)),
            ],
            out_specs=pl.BlockSpec((tm, c2), lambda i: (i, 0)),
        ),
        compiler_params=_compiler_params(("parallel",), need),
    )(m2d, y2_2d, w3s, b1, b2, w4)


# ----------------------------------------------------------------------------
# full BottleneckCSP forward (NCHW in / NCHW out, matching the PyTorch module)
# ----------------------------------------------------------------------------
def bottleneck_csp_forward(x_nchw, params, shortcut=True,
                           compute_dtype=jnp.bfloat16):
    # TODO(synk): grouped conv (groups != 1) not supported; module default g=1.
    n, c1, h, w = x_nchw.shape
    out_dtype = x_nchw.dtype
    cdt = compute_dtype

    # PyTorch OIHW weights -> matmul layouts (kept f32 for folding, cast later).
    w_cv1 = params["cv1_w"][:, :, 0, 0].T                             # (c1, c_)
    w_cv2 = params["cv2_w"][:, :, 0, 0].T                             # (c1, c_)
    w_cv3 = params["cv3_w"][:, :, 0, 0].T                             # (c_, c_)
    w_cv4 = params["cv4_w"][:, :, 0, 0].T                             # (2c_, c2)
    c_ = w_cv1.shape[1]
    c2 = w_cv4.shape[1]

    # Inference-mode BatchNorm: scale folded into the producing 1x1 weights
    # (exact for bias-free convs); only the shift is applied in the tail.
    scale = (params["bn_gamma"] /
             jnp.sqrt(params["bn_var"] + BN_EPS)).astype(jnp.float32)
    shift = (params["bn_beta"] - params["bn_mean"] * scale).astype(jnp.float32)
    s1, s2 = scale[:c_], scale[c_:]
    b1 = shift[:c_].reshape(1, c_)
    b2 = shift[c_:].reshape(1, c_)

    w12 = jnp.concatenate([w_cv1, w_cv2 * s2[None, :]], axis=1).astype(cdt)
    w3s = (w_cv3 * s1[None, :]).astype(cdt)
    w4 = w_cv4.astype(cdt)

    nb = len(params["m_w1"])
    if nb:
        w1_stack = jnp.stack(
            [wi[:, :, 0, 0].T for wi in params["m_w1"]]).astype(cdt)   # (nb,c_,c_)
        w2_stack = jnp.stack(
            [jnp.transpose(wi, (2, 3, 1, 0)).reshape(9 * c_, c_)
             for wi in params["m_w2"]]).astype(cdt)                    # (nb,9c_,c_)

    # NCHW -> NHWC exactly once; everything stays NHWC / flat until the end.
    x = jnp.transpose(x_nchw, (0, 2, 3, 1)).astype(cdt)
    x2d = x.reshape(n * h * w, c1)

    y1_2d, y2_2d = _csp_head(x2d, w12, c_)

    hcur = y1_2d.reshape(n, h, w, c_)
    if nb:
        hcur = _bottleneck_chain(hcur, w1_stack, w2_stack, shortcut)

    out2d = _csp_tail(hcur.reshape(n * h * w, c_), y2_2d, w3s, b1, b2, w4, cdt)
    out = out2d.reshape(n, h, w, c2)
    return jnp.transpose(out, (0, 3, 1, 2)).astype(out_dtype)


# ----------------------------------------------------------------------------
# pure-JAX (XLA) reference in f32 for validation
# ----------------------------------------------------------------------------
def _reference_forward(x, params):
    def conv(v, w_oihw, pad):
        return lax.conv_general_dilated(
            v, w_oihw, (1, 1), ((pad, pad), (pad, pad)),
            dimension_numbers=("NCHW", "OIHW", "NCHW"))

    h = _leaky(conv(x, params["cv1_w"], 0), LEAKY_64)                 # cv1
    for w1, w2 in zip(params["m_w1"], params["m_w2"]):
        t = _leaky(conv(h, w1, 0), LEAKY_64)
        t = _leaky(conv(t, w2, 1), LEAKY_64)
        h = h + t
    y1 = conv(h, params["cv3_w"], 0)                                  # cv3
    y2 = conv(x, params["cv2_w"], 0)                                  # cv2
    cat = jnp.concatenate([y1, y2], axis=1)
    scale = params["bn_gamma"] / jnp.sqrt(params["bn_var"] + BN_EPS)
    shift = params["bn_beta"] - params["bn_mean"] * scale
    z = cat * scale[None, :, None, None] + shift[None, :, None, None]
    z = _leaky(z, LEAKY_01)
    return _leaky(conv(z, params["cv4_w"], 0), LEAKY_64)              # cv4


if __name__ == "__main__":
    n, c1, hh, ww = 2, 8, 16, 16
    c2 = 16
    nb = 2                     # number of Bottleneck blocks (module arg n)
    c_ = int(c2 * 0.5)         # e = 0.5

    keys = jax.random.split(jax.random.PRNGKey(0), 17)

    def rw(k, shape, fan_in):
        return jax.random.normal(k, shape, jnp.float32) / math.sqrt(fan_in)

    params = {
        "cv1_w": rw(keys[0], (c_, c1, 1, 1), c1),
        "cv2_w": rw(keys[1], (c_, c1, 1, 1), c1),
        "cv3_w": rw(keys[2], (c_, c_, 1, 1), c_),
        "cv4_w": rw(keys[3], (c2, 2 * c_, 1, 1), 2 * c_),
        "m_w1": [rw(keys[4 + i], (c_, c_, 1, 1), c_) for i in range(nb)],
        "m_w2": [rw(keys[8 + i], (c_, c_, 3, 3), 9 * c_) for i in range(nb)],
        "bn_gamma": 0.5 + jax.random.uniform(keys[12], (2 * c_,), jnp.float32),
        "bn_beta": 0.1 * jax.random.normal(keys[13], (2 * c_,), jnp.float32),
        "bn_mean": 0.1 * jax.random.normal(keys[14], (2 * c_,), jnp.float32),
        "bn_var": 0.5 + jax.random.uniform(keys[15], (2 * c_,), jnp.float32),
    }
    x = jax.random.normal(keys[16], (n, c1, hh, ww), jnp.float32)

    ref = jax.block_until_ready(_reference_forward(x, params))

    # fast path: bf16 activations/weights, f32 accumulation
    out_bf16 = jax.block_until_ready(
        bottleneck_csp_forward(x, params, compute_dtype=jnp.bfloat16))
    # f32 path for a tighter numerical check
    out_f32 = jax.block_until_ready(
        bottleneck_csp_forward(x, params, compute_dtype=jnp.float32))

    assert out_bf16.shape == (n, c2, hh, ww), out_bf16.shape
    assert out_f32.shape == (n, c2, hh, ww), out_f32.shape
    assert jnp.allclose(out_f32, ref, atol=3e-2, rtol=3e-2), \
        float(jnp.max(jnp.abs(out_f32 - ref)))
    assert jnp.allclose(out_bf16, ref, atol=2e-1, rtol=1e-1), \
        float(jnp.max(jnp.abs(out_bf16 - ref)))
    print("KERNEL_OK")
</pallas_src>

<mosaic_0001>
module attributes {stable_mosaic.version = 11 : i64} {
  func.func @_csp_head_kernel(%arg0: i32, %arg1: memref<512x8xbf16, #tpu.memory_space<vmem>>, %arg2: memref<8x16xbf16, #tpu.memory_space<vmem>>, %arg3: memref<512x8xbf16, #tpu.memory_space<vmem>>, %arg4: memref<512x8xbf16, #tpu.memory_space<vmem>>) attributes {dimension_semantics = [#tpu.dimension_semantics<parallel>], iteration_bounds = array<i64: 1>, scalar_prefetch = 0 : i64, scratch_operands = 0 : i64, tpu.core_type = #tpu.core_type<tc>, window_params = [{transform_indices = @transform_0, window_bounds = array<i64: 512, 8>}, {pipeline_mode = #tpu.pipeline_mode<synchronous>, transform_indices = @transform_1, window_bounds = array<i64: 8, 16>}, {transform_indices = @transform_2, window_bounds = array<i64: 512, 8>}, {transform_indices = @transform_3, window_bounds = array<i64: 512, 8>}]} {
    %c0 = arith.constant 0 : index
    %c0_0 = arith.constant 0 : index
    %0 = vector.load %arg1[%c0, %c0_0] : memref<512x8xbf16, #tpu.memory_space<vmem>>, vector<512x8xbf16>
    %c0_1 = arith.constant 0 : index
    %c0_2 = arith.constant 0 : index
    %1 = vector.load %arg2[%c0_1, %c0_2] : memref<8x16xbf16, #tpu.memory_space<vmem>>, vector<8x16xbf16>
    %cst = arith.constant dense<0.000000e+00> : vector<512x16xf32>
    %2 = tpu.matmul %0, %1, %cst {dimension_numbers = #tpu.dot_dimension_numbers<[1], [0], [0], [1], [0, 0, 1, 1], [], []>} : vector<512x8xbf16>, vector<8x16xbf16>, vector<512x16xf32> -> vector<512x16xf32>
    %3 = vector.extract_strided_slice %2 {offsets = [0, 0], sizes = [512, 8], strides = [1, 1]} : vector<512x16xf32> to vector<512x8xf32>
    %cst_3 = arith.constant 0.000000e+00 : f32
    %4 = vector.broadcast %cst_3 : f32 to vector<512x8xf32>
    %5 = arith.cmpf oge, %3, %4 : vector<512x8xf32>
    %cst_4 = arith.constant 1.562500e-02 : f32
    %6 = vector.broadcast %cst_4 : f32 to vector<512x8xf32>
    %7 = arith.mulf %3, %6 : vector<512x8xf32>
    %8 = arith.select %5, %3, %7 : vector<512x8xi1>, vector<512x8xf32>
    %9 = arith.truncf %8 : vector<512x8xf32> to vector<512x8xbf16>
    %c0_5 = arith.constant 0 : index
    %c0_6 = arith.constant 0 : index
    %10 = vector.load %arg3[%c0_5, %c0_6] : memref<512x8xbf16, #tpu.memory_space<vmem>>, vector<512x8xbf16>
    tpu.vector_store %arg3[%c0_5, %c0_6], %9 {strides = array<i32>} : memref<512x8xbf16, #tpu.memory_space<vmem>>, vector<512x8xbf16>,
    %11 = vector.extract_strided_slice %2 {offsets = [0, 8], sizes = [512, 8], strides = [1, 1]} : vector<512x16xf32> to vector<512x8xf32>
    %12 = arith.truncf %11 : vector<512x8xf32> to vector<512x8xbf16>
    %c0_7 = arith.constant 0 : index
    %c0_8 = arith.constant 0 : index
    %13 = vector.load %arg4[%c0_7, %c0_8] : memref<512x8xbf16, #tpu.memory_space<vmem>>, vector<512x8xbf16>
    tpu.vector_store %arg4[%c0_7, %c0_8], %12 {strides = array<i32>} : memref<512x8xbf16, #tpu.memory_space<vmem>>, vector<512x8xbf16>,
    return
  }
  func.func @transform_0(%arg0: i32) -> (i32, i32) {
    %c0_i32 = arith.constant 0 : i32
    %c0_i32_0 = arith.constant 0 : i32
    return %arg0, %c0_i32 : i32, i32
  }
  func.func @transform_1(%arg0: i32) -> (i32, i32) {
    %c0_i32 = arith.constant 0 : i32
    %c0_i32_0 = arith.constant 0 : i32
    %c0_i32_1 = arith.constant 0 : i32
    return %c0_i32, %c0_i32_0 : i32, i32
  }
  func.func @transform_2(%arg0: i32) -> (i32, i32) {
    %c0_i32 = arith.constant 0 : i32
    %c0_i32_0 = arith.constant 0 : i32
    return %arg0, %c0_i32 : i32, i32
  }
  func.func @transform_3(%arg0: i32) -> (i32, i32) {
    %c0_i32 = arith.constant 0 : i32
    %c0_i32_0 = arith.constant 0 : i32
    return %arg0, %c0_i32 : i32, i32
  }
}

</mosaic_0001>

<bundles_post_ra>
// kernel: tpu_custom_call.1
= control target key start
LH: loop header
LB: loop body
LE: loop exit
PB: predicated region body
PF: predicated region fallthrough
CT: control target
= control target key end

     0   :  { %vm336_vm0 = vcmask 1043456   ;;  %vm239_vm1 = vcmask 64512   ;;  %vm765_vm4 = vcmask 60416   ;;  %s2489_s1 = inlined_call_operand.vmem [shape: bf16[8,16], index: 1, kind: input, shape index: {}]   ;;  %s2490_s0 = inlined_call_operand.vmem [shape: bf16[512,8], index: 0, kind: input, shape index: {}]   ;;  %s2491_s2 = inlined_call_operand.vmem [shape: bf16[512,8], index: 2, kind: output, shape index: {0}]   ;;  %s2492_s3 = inlined_call_operand.vmem [shape: bf16[512,8], index: 3, kind: output, shape index: {1}]  }
   0x1   :  { %v78_v0 = vld [vmem:[%s2489_s1] sm:$0xf]  ;;  %v1383_v6 = vld [vmem:[%s2490_s0 + $0x8] sm:$0xff]  ;;  %v1384_v10 = vld [vmem:[%s2490_s0 + $0x10] sm:$0xff]  ;;  %s1418_s1 = smov 120  }
   0x2   :  { %v338_v1 = vsel %vm336_vm0, %v78_v0, 0  ;;  %v1382_v2 = vld [vmem:[%s2490_s0] sm:$0xff]  ;;  %v1391_v7 = vld [vmem:[%s2490_s0 + $0x48] sm:$0xff]  ;;  %v1392_v11 = vld [vmem:[%s2490_s0 + $0x50] sm:$0xff] }
   0x3   :  { %v1390_v3 = vld [vmem:[%s2490_s0 + $0x40] sm:$0xff]  ;;  %347 = vmatpush.bf16.msra.mxu0 %v338_v1  ;;  %1414 = vmatpush.bf16.msra.mxu1 %v338_v1  ;;  %v1399_v8 = vld [vmem:[%s2490_s0 + $0x88] sm:$0xff]  ;;  %v1400_v12 = vld [vmem:[%s2490_s0 + $0x90] sm:$0xff] }
   0x4   :  { %v1398_v4 = vld [vmem:[%s2490_s0 + $0x80] sm:$0xff]  ;;  %1415 = vmatpush.bf16.msra.mxu2 %v338_v1  ;;  %1416 = vmatpush.bf16.msra.mxu3 %v338_v1  ;;  %v1407_v9 = vld [vmem:[%s2490_s0 + $0xc8] sm:$0xff]  ;;  %v1408_v13 = vld [vmem:[%s2490_s0 + $0xd0] sm:$0xff] }
   0x5   :  { %v1406_v5 = vld [vmem:[%s2490_s0 + $0xc0] sm:$0xff]  ;;  %v1385_v14 = vld [vmem:[%s2490_s0 + $0x18] sm:$0xff]  ;;  %v1387_v22 = vld [vmem:[%s2490_s0 + $0x28] sm:$0xff] }
   0x6   :  { %1350 = vmatmul.msk.bf16.vlgmr.msra.gmra.mxu0 %vm239_vm1, %v1382_v2  ;;  %1358 = vmatmul.msk.bf16.vlgmr.msra.gmra.mxu1 %vm239_vm1, %v1390_v3  ;;  %v1393_v15 = vld [vmem:[%s2490_s0 + $0x58] sm:$0xff]  ;;  %v1386_v18 = vld [vmem:[%s2490_s0 + $0x20] sm:$0xff]  ;;  %v1395_v23 = vld [vmem:[%s2490_s0 + $0x68] sm:$0xff] }
   0x7   :  { %1366 = vmatmul.msk.bf16.vlgmr.msra.gmra.mxu2 %vm239_vm1, %v1398_v4  ;;  %1374 = vmatmul.msk.bf16.vlgmr.msra.gmra.mxu3 %vm239_vm1, %v1406_v5  ;;  %v1401_v16 = vld [vmem:[%s2490_s0 + $0x98] sm:$0xff]  ;;  %v1394_v19 = vld [vmem:[%s2490_s0 + $0x60] sm:$0xff]  ;;  %v1403_v24 = vld [vmem:[%s2490_s0 + $0xa8] sm:$0xff] }
   0x8   :  { %v1409_v17 = vld [vmem:[%s2490_s0 + $0xd8] sm:$0xff]  ;;  %v1402_v20 = vld [vmem:[%s2490_s0 + $0xa0] sm:$0xff]  ;;  %v1411_v25 = vld [vmem:[%s2490_s0 + $0xe8] sm:$0xff] }
   0x9   :  { %v1410_v21 = vld [vmem:[%s2490_s0 + $0xe0] sm:$0xff]  ;;  %v1388_v26 = vld [vmem:[%s2490_s0 + $0x30] sm:$0xff]  ;;  %v1405_v30 = vld [vmem:[%s2490_s0 + $0xb8] sm:$0xff] }
   0xa   :  { %v1404_v27 = vld [vmem:[%s2490_s0 + $0xb0] sm:$0xff]  ;;  %v1397_v31 = vld [vmem:[%s2490_s0 + $0x78] sm:$0xff] }
   0xb   :  { %v1412_v28 = vld [vmem:[%s2490_s0 + $0xf0] sm:$0xff]  ;;  %v1389_v32 = vld [vmem:[%s2490_s0 + $0x38] sm:$0xff] }
   0xc   :  { %v1396_v29 = vld [vmem:[%s2490_s0 + $0x70] sm:$0xff]  ;;  %v1413_v33 = vld [vmem:[%s2490_s0 + $0xf8] sm:$0xff] }
  0x16   :  { %1351 = vmatmul.msk.bf16.gmra.mxu0 %vm239_vm1, %v1383_v6  ;;  %1359 = vmatmul.msk.bf16.gmra.mxu1 %vm239_vm1, %v1391_v7 }
  0x17   :  { %1367 = vmatmul.msk.bf16.gmra.mxu2 %vm239_vm1, %v1399_v8  ;;  %1375 = vmatmul.msk.bf16.gmra.mxu3 %vm239_vm1, %v1407_v9 }
  0x26   :  { %1352 = vmatmul.msk.bf16.gmra.mxu0 %vm239_vm1, %v1384_v10  ;;  %1360 = vmatmul.msk.bf16.gmra.mxu1 %vm239_vm1, %v1392_v11 }
  0x27   :  { %1368 = vmatmul.msk.bf16.gmra.mxu2 %vm239_vm1, %v1400_v12  ;;  %1376 = vmatmul.msk.bf16.gmra.mxu3 %vm239_vm1, %v1408_v13 }
  0x36   :  { %1353 = vmatmul.msk.bf16.gmra.mxu0 %vm239_vm1, %v1385_v14  ;;  %1361 = vmatmul.msk.bf16.gmra.mxu1 %vm239_vm1, %v1393_v15 }
  0x37   :  { %1369 = vmatmul.msk.bf16.gmra.mxu2 %vm239_vm1, %v1401_v16  ;;  %1377 = vmatmul.msk.bf16.gmra.mxu3 %vm239_vm1, %v1409_v17 }
  0x46   :  { %1354 = vmatmul.msk.bf16.gmra.mxu0 %vm239_vm1, %v1386_v18  ;;  %1362 = vmatmul.msk.bf16.gmra.mxu1 %vm239_vm1, %v1394_v19 }
  0x47   :  { %1370 = vmatmul.msk.bf16.gmra.mxu2 %vm239_vm1, %v1402_v20  ;;  %1378 = vmatmul.msk.bf16.gmra.mxu3 %vm239_vm1, %v1410_v21 }
  0x56   :  { %1355 = vmatmul.msk.bf16.gmra.mxu0 %vm239_vm1, %v1387_v22  ;;  %1363 = vmatmul.msk.bf16.gmra.mxu1 %vm239_vm1, %v1395_v23 }
  0x57   :  { %1371 = vmatmul.msk.bf16.gmra.mxu2 %vm239_vm1, %v1403_v24  ;;  %1379 = vmatmul.msk.bf16.gmra.mxu3 %vm239_vm1, %v1411_v25 }
  0x66   :  { %1356 = vmatmul.msk.bf16.gmra.mxu0 %vm239_vm1, %v1388_v26  ;;  %1364 = vmatmul.msk.bf16.gmra.mxu1 %vm239_vm1, %v1396_v29 }
  0x67   :  { %1372 = vmatmul.msk.bf16.gmra.mxu2 %vm239_vm1, %v1404_v27  ;;  %1380 = vmatmul.msk.bf16.gmra.mxu3 %vm239_vm1, %v1412_v28 }
  0x76   :  { %1365 = vmatmul.msk.bf16.gmra.mxu1 %vm239_vm1, %v1397_v31  ;;  %1357 = vmatmul.msk.bf16.gmra.mxu0 %vm239_vm1, %v1389_v32 }
  0x77   :  { %1373 = vmatmul.msk.bf16.gmra.mxu2 %vm239_vm1, %v1405_v30  ;;  %1381 = vmatmul.msk.bf16.gmra.mxu3 %vm239_vm1, %v1413_v33 }
  0x83   :  { %v349_v34 = vpop.f32.mrf.mxu0  ;;  %v389_v35 = vpop.f32.mrf.mxu1 }
  0x84   :  { %vm509_vm2 = vcmp.ge.f32.partialorder %v349_v34, 0.0  ;;  %v573_v36 = vmul.f32 0.015625, %v349_v34  ;;  %vm525_vm3 = vcmp.ge.f32.partialorder %v389_v35, 0.0  ;;  %v589_v37 = vmul.f32 0.015625, %v389_v35 }
  0x85   :  { %v830_v38 = vpack.c.bf16 %v349_v34, %v349_v34  ;;  %v846_v39 = vpack.c.bf16 %v389_v35, %v389_v35 }
  0x86   :  { %v637_v40 = vsel %vm509_vm2, %v349_v34, %v573_v36  ;;  %v653_v41 = vsel %vm525_vm3, %v389_v35, %v589_v37 }
  0x87   :  { %v701_v42 = vpack.c.bf16 %v637_v40, %v637_v40  ;;  %v717_v43 = vpack.c.bf16 %v653_v41, %v653_v41  ;;  %958 = vrot.lane.b32.xlu0 %v830_v38, %s1418_s1  ;;  %990 = vrot.lane.b32.xlu1 %v846_v39, %s1418_s1 }
  0x89   :  { %766 = vst.msk [vmem:[%s2491_s2] sm:$0xf] %vm765_vm4, %v701_v42 }
  0x8a   :  { %782 = vst.msk [vmem:[%s2491_s2 + $0x40] sm:$0xf] %vm765_vm4, %v717_v43  ;;  %v429_v44 = vpop.f32.mrf.mxu2  ;;  %v469_v45 = vpop.f32.mrf.mxu3 }
  0x8b   :  { %vm541_vm5 = vcmp.ge.f32.partialorder %v429_v44, 0.0  ;;  %v605_v46 = vmul.f32 0.015625, %v429_v44  ;;  %vm557_vm6 = vcmp.ge.f32.partialorder %v469_v45, 0.0  ;;  %v621_v47 = vmul.f32 0.015625, %v469_v45  ;;  %v351_v48 = vpop.f32.mrf.mxu0  ;;  %v391_v49 = vpop.f32.mrf.mxu1 }
  0x8c   :  { %vm510_vm7 = vcmp.ge.f32.partialorder %v351_v48, 0.0  ;;  %v574_v50 = vmul.f32 0.015625, %v351_v48  ;;  %vm526_vm8 = vcmp.ge.f32.partialorder %v391_v49, 0.0  ;;  %v590_v51 = vmul.f32 0.015625, %v391_v49 }
  0x8d   :  { %v669_v52 = vsel %vm541_vm5, %v429_v44, %v605_v46  ;;  %v685_v53 = vsel %vm557_vm6, %v469_v45, %v621_v47  ;;  %v862_v54 = vpack.c.bf16 %v429_v44, %v429_v44  ;;  %v878_v55 = vpack.c.bf16 %v469_v45, %v469_v45 }
  0x8e   :  { %v733_v56 = vpack.c.bf16 %v669_v52, %v669_v52  ;;  %v749_v57 = vpack.c.bf16 %v685_v53, %v685_v53  ;;  %v638_v58 = vsel %vm510_vm7, %v351_v48, %v574_v50  ;;  %v654_v59 = vsel %vm526_vm8, %v391_v49, %v590_v51 }
  0x8f   :  { %v702_v60 = vpack.c.bf16 %v638_v58, %v638_v58  ;;  %v718_v61 = vpack.c.bf16 %v654_v59, %v654_v59  ;;  %1022 = vrot.lane.b32.xlu2 %v862_v54, %s1418_s1  ;;  %1054 = vrot.lane.b32.xlu0 %v878_v55, %s1418_s1  ;;  %v847_v0 = vpack.c.bf16 %v391_v49, %v391_v49 }
  0x90   :  { %798 = vst.msk [vmem:[%s2491_s2 + $0x80] sm:$0xf] %vm765_vm4, %v733_v56  ;;  %v831_v9 = vpack.c.bf16 %v351_v48, %v351_v48 }
  0x91   :  { %814 = vst.msk [vmem:[%s2491_s2 + $0xc0] sm:$0xf] %vm765_vm4, %v749_v57 }
  0x92   :  { %767 = vst.msk [vmem:[%s2491_s2 + $0x4] sm:$0xf] %vm765_vm4, %v702_v60  ;;  %v431_v62 = vpop.f32.mrf.mxu2  ;;  %v471_v63 = vpop.f32.mrf.mxu3 }
  0x93   :  { %783 = vst.msk [vmem:[%s2491_s2 + $0x44] sm:$0xf] %vm765_vm4, %v718_v61  ;;  %vm542_vm9 = vcmp.ge.f32.partialorder %v431_v62, 0.0  ;;  %v606_v1 = vmul.f32 0.015625, %v431_v62  ;;  %vm558_vm10 = vcmp.ge.f32.partialorder %v471_v63, 0.0  ;;  %v622_v2 = vmul.f32 0.015625, %v471_v63  ;;  %v354_v3 = vpop.f32.mrf.mxu0  ;;  %v1598_v4 = vpop.f32.mrf.mxu1 }
  0x94   :  { %vm511_vm11 = vcmp.ge.f32.partialorder %v354_v3, 0.0  ;;  %v575_v5 = vmul.f32 0.015625, %v354_v3  ;;  %v879_v6 = vpack.c.bf16 %v471_v63, %v471_v63  ;;  %vm527_vm12 = vcmp.ge.f32.partialorder %v1598_v4, 0.0 }
  0x95   :  { %v670_v7 = vsel %vm542_vm9, %v431_v62, %v606_v1  ;;  %v686_v8 = vsel %vm558_vm10, %v471_v63, %v622_v2  ;;  %v591_v10 = vmul.f32 0.015625, %v1598_v4  ;;  %v832_v19 = vpack.c.bf16 %v354_v3, %v354_v3 }
  0x96   :  { %v734_v11 = vpack.c.bf16 %v670_v7, %v670_v7  ;;  %v750_v12 = vpack.c.bf16 %v686_v8, %v686_v8  ;;  %v639_v13 = vsel %vm511_vm11, %v354_v3, %v575_v5  ;;  %1056 = vrot.lane.b32.xlu1 %v879_v6, %s1418_s1  ;;  %v863_v28 = vpack.c.bf16 %v431_v62, %v431_v62 }
  0x97   :  { %v703_v14 = vpack.c.bf16 %v639_v13, %v639_v13  ;;  %992 = vrot.lane.b32.xlu2 %v847_v0, %s1418_s1  ;;  %960 = vrot.lane.b32.xlu0 %v831_v9, %s1418_s1  ;;  %v655_v15 = vsel %vm527_vm12, %v1598_v4, %v591_v10  ;;  %v848_v39 = vpack.c.bf16 %v1598_v4, %v1598_v4 }
  0x98   :  { %799 = vst.msk [vmem:[%s2491_s2 + $0x84] sm:$0xf] %vm765_vm4, %v734_v11  ;;  %v719_v16 = vpack.c.bf16 %v655_v15, %v655_v15 }
  0x99   :  { %815 = vst.msk [vmem:[%s2491_s2 + $0xc4] sm:$0xf] %vm765_vm4, %v750_v12 }
  0x9a   :  { %768 = vst.msk [vmem:[%s2491_s2 + $0x8] sm:$0xf] %vm765_vm4, %v703_v14  ;;  %v434_v17 = vpop.f32.mrf.mxu2  ;;  %v474_v18 = vpop.f32.mrf.mxu3 }
  0x9b   :  { %784 = vst.msk [vmem:[%s2491_s2 + $0x48] sm:$0xf] %vm765_vm4, %v719_v16  ;;  %vm543_vm13 = vcmp.ge.f32.partialorder %v434_v17, 0.0  ;;  %v607_v20 = vmul.f32 0.015625, %v434_v17  ;;  %vm559_vm14 = vcmp.ge.f32.partialorder %v474_v18, 0.0  ;;  %v623_v21 = vmul.f32 0.015625, %v474_v18  ;;  %v1622_v22 = vpop.f32.mrf.mxu0  ;;  %v1624_v23 = vpop.f32.mrf.mxu1 }
  0x9c   :  { %vm512_vm15 = vcmp.ge.f32.partialorder %v1622_v22, 0.0  ;;  %v576_v24 = vmul.f32 0.015625, %v1622_v22  ;;  %v880_v25 = vpack.c.bf16 %v474_v18, %v474_v18  ;;  %vm528_vm0 = vcmp.ge.f32.partialorder %v1624_v23, 0.0 }
  0x9d   :  { %v671_v26 = vsel %vm543_vm13, %v434_v17, %v607_v20  ;;  %v687_v27 = vsel %vm559_vm14, %v474_v18, %v623_v21  ;;  %v592_v29 = vmul.f32 0.015625, %v1624_v23  ;;  %v864_v38 = vpack.c.bf16 %v434_v17, %v434_v17 }
  0x9e   :  { %v735_v30 = vpack.c.bf16 %v671_v26, %v671_v26  ;;  %v751_v31 = vpack.c.bf16 %v687_v27, %v687_v27  ;;  %v640_v32 = vsel %vm512_vm15, %v1622_v22, %v576_v24  ;;  %962 = vrot.lane.b32.xlu1 %v832_v19, %s1418_s1  ;;  %v833_v56 = vpack.c.bf16 %v1622_v22, %v1622_v22 }
  0x9f   :  { %v704_v33 = vpack.c.bf16 %v640_v32, %v640_v32  ;;  %1058 = vrot.lane.b32.xlu2 %v880_v25, %s1418_s1  ;;  %1024 = vrot.lane.b32.xlu0 %v863_v28, %s1418_s1  ;;  %v656_v34 = vsel %vm528_vm0, %v1624_v23, %v592_v29  ;;  %v849_v11 = vpack.c.bf16 %v1624_v23, %v1624_v23 }
  0xa0   :  { %800 = vst.msk [vmem:[%s2491_s2 + $0x88] sm:$0xf] %vm765_vm4, %v735_v30  ;;  %v720_v35 = vpack.c.bf16 %v656_v34, %v656_v34 }
  0xa1   :  { %816 = vst.msk [vmem:[%s2491_s2 + $0xc8] sm:$0xf] %vm765_vm4, %v751_v31 }
  0xa2   :  { %769 = vst.msk [vmem:[%s2491_s2 + $0xc] sm:$0xf] %vm765_vm4, %v704_v33  ;;  %v436_v36 = vpop.f32.mrf.mxu2  ;;  %v476_v37 = vpop.f32.mrf.mxu3 }
  0xa3   :  { %785 = vst.msk [vmem:[%s2491_s2 + $0x4c] sm:$0xf] %vm765_vm4, %v720_v35  ;;  %vm544_vm1 = vcmp.ge.f32.partialorder %v436_v36, 0.0  ;;  %v608_v40 = vmul.f32 0.015625, %v436_v36  ;;  %vm560_vm2 = vcmp.ge.f32.partialorder %v476_v37, 0.0  ;;  %v624_v41 = vmul.f32 0.015625, %v476_v37  ;;  %v359_v42 = vpop.f32.mrf.mxu0  ;;  %v1653_v43 = vpop.f32.mrf.mxu1 }
  0xa4   :  { %v865_v44 = vpack.c.bf16 %v436_v36, %v436_v36  ;;  %vm513_vm3 = vcmp.ge.f32.partialorder %v359_v42, 0.0  ;;  %v577_v45 = vmul.f32 0.015625, %v359_v42  ;;  %vm529_vm5 = vcmp.ge.f32.partialorder %v1653_v43, 0.0 }
  0xa5   :  { %v672_v46 = vsel %vm544_vm1, %v436_v36, %v608_v40  ;;  %v688_v47 = vsel %vm560_vm2, %v476_v37, %v624_v41  ;;  %v593_v48 = vmul.f32 0.015625, %v1653_v43  ;;  %v834_v57 = vpack.c.bf16 %v359_v42, %v359_v42 }
  0xa6   :  { %v736_v49 = vpack.c.bf16 %v672_v46, %v672_v46  ;;  %v752_v50 = vpack.c.bf16 %v688_v47, %v688_v47  ;;  %1026 = vrot.lane.b32.xlu1 %v864_v38, %s1418_s1  ;;  %v641_v51 = vsel %vm513_vm3, %v359_v42, %v577_v45  ;;  %v881_v2 = vpack.c.bf16 %v476_v37, %v476_v37 }
  0xa7   :  { %1028 = vrot.lane.b32.xlu2 %v865_v44, %s1418_s1  ;;  %994 = vrot.lane.b32.xlu0 %v848_v39, %s1418_s1  ;;  %v705_v52 = vpack.c.bf16 %v641_v51, %v641_v51  ;;  %v657_v53 = vsel %vm529_vm5, %v1653_v43, %v593_v48  ;;  %v850_v12 = vpack.c.bf16 %v1653_v43, %v1653_v43 }
  0xa8   :  { %801 = vst.msk [vmem:[%s2491_s2 + $0x8c] sm:$0xf] %vm765_vm4, %v736_v49  ;;  %v721_v54 = vpack.c.bf16 %v657_v53, %v657_v53 }
  0xa9   :  { %817 = vst.msk [vmem:[%s2491_s2 + $0xcc] sm:$0xf] %vm765_vm4, %v752_v50 }
  0xaa   :  { %770 = vst.msk [vmem:[%s2491_s2 + $0x10] sm:$0xf] %vm765_vm4, %v705_v52  ;;  %v439_v55 = vpop.f32.mrf.mxu2  ;;  %v1675_v58 = vpop.f32.mrf.mxu3 }
  0xab   :  { %786 = vst.msk [vmem:[%s2491_s2 + $0x50] sm:$0xf] %vm765_vm4, %v721_v54  ;;  %vm545_vm6 = vcmp.ge.f32.partialorder %v439_v55, 0.0  ;;  %v609_v59 = vmul.f32 0.015625, %v439_v55  ;;  %v1681_v60 = vpop.f32.mrf.mxu0  ;;  %v1683_v61 = vpop.f32.mrf.mxu1  ;;  %vm561_vm7 = vcmp.ge.f32.partialorder %v1675_v58, 0.0  ;;  %v625_v62 = vmul.f32 0.015625, %v1675_v58 }
  0xac   :  { %vm514_vm8 = vcmp.ge.f32.partialorder %v1681_v60, 0.0  ;;  %v578_v63 = vmul.f32 0.015625, %v1681_v60  ;;  %vm530_vm9 = vcmp.ge.f32.partialorder %v1683_v61, 0.0  ;;  %v594_v0 = vmul.f32 0.015625, %v1683_v61 }
  0xad   :  { %v673_v1 = vsel %vm545_vm6, %v439_v55, %v609_v59  ;;  %v689_v3 = vsel %vm561_vm7, %v1675_v58, %v625_v62  ;;  %v866_v13 = vpack.c.bf16 %v439_v55, %v439_v55  ;;  %v882_v29 = vpack.c.bf16 %v1675_v58, %v1675_v58 }
  0xae   :  { %v737_v4 = vpack.c.bf16 %v673_v1, %v673_v1  ;;  %964 = vrot.lane.b32.xlu1 %v833_v56, %s1418_s1  ;;  %v642_v5 = vsel %vm514_vm8, %v1681_v60, %v578_v63  ;;  %v658_v6 = vsel %vm530_vm9, %v1683_v61, %v594_v0  ;;  %v753_v9 = vpack.c.bf16 %v689_v3, %v689_v3 }
  0xaf   :  { %966 = vrot.lane.b32.xlu2 %v834_v57, %s1418_s1  ;;  %1060 = vrot.lane.b32.xlu0 %v881_v2, %s1418_s1  ;;  %v706_v7 = vpack.c.bf16 %v642_v5, %v642_v5  ;;  %v722_v8 = vpack.c.bf16 %v658_v6, %v658_v6  ;;  %v835_v38 = vpack.c.bf16 %v1681_v60, %v1681_v60 }
  0xb0   :  { %802 = vst.msk [vmem:[%s2491_s2 + $0x90] sm:$0xf] %vm765_vm4, %v737_v4  ;;  %v851_v39 = vpack.c.bf16 %v1683_v61, %v1683_v61 }
  0xb1   :  { %771 = vst.msk [vmem:[%s2491_s2 + $0x14] sm:$0xf] %vm765_vm4, %v706_v7 }
  0xb2   :  { %787 = vst.msk [vmem:[%s2491_s2 + $0x54] sm:$0xf] %vm765_vm4, %v722_v8  ;;  %v1709_v10 = vpop.f32.mrf.mxu2  ;;  %v1715_v14 = vpop.f32.mrf.mxu3 }
  0xb3   :  { %vm546_vm10 = vcmp.ge.f32.partialorder %v1709_v10, 0.0  ;;  %v610_v15 = vmul.f32 0.015625, %v1709_v10  ;;  %818 = vst.msk [vmem:[%s2491_s2 + $0xd0] sm:$0xf] %vm765_vm4, %v753_v9  ;;  %v1723_v16 = vpop.f32.mrf.mxu0  ;;  %vm562_vm11 = vcmp.ge.f32.partialorder %v1715_v14, 0.0  ;;  %v626_v17 = vmul.f32 0.015625, %v1715_v14  ;;  %v1727_v18 = vpop.f32.mrf.mxu1 }
  0xb4   :  { %vm515_vm12 = vcmp.ge.f32.partialorder %v1723_v16, 0.0  ;;  %v579_v19 = vmul.f32 0.015625, %v1723_v16  ;;  %vm531_vm13 = vcmp.ge.f32.partialorder %v1727_v18, 0.0  ;;  %v595_v20 = vmul.f32 0.015625, %v1727_v18 }
  0xb5   :  { %v674_v21 = vsel %vm546_vm10, %v1709_v10, %v610_v15  ;;  %v690_v22 = vsel %vm562_vm11, %v1715_v14, %v626_v17  ;;  %v867_v48 = vpack.c.bf16 %v1709_v10, %v1709_v10  ;;  %v836_v49 = vpack.c.bf16 %v1723_v16, %v1723_v16 }
  0xb6   :  { %v738_v23 = vpack.c.bf16 %v674_v21, %v674_v21  ;;  %996 = vrot.lane.b32.xlu1 %v849_v11, %s1418_s1  ;;  %v643_v24 = vsel %vm515_vm12, %v1723_v16, %v579_v19  ;;  %v754_v25 = vpack.c.bf16 %v690_v22, %v690_v22  ;;  %v659_v26 = vsel %vm531_vm13, %v1727_v18, %v595_v20 }
  0xb7   :  { %998 = vrot.lane.b32.xlu2 %v850_v12, %s1418_s1  ;;  %1030 = vrot.lane.b32.xlu0 %v866_v13, %s1418_s1  ;;  %v707_v27 = vpack.c.bf16 %v643_v24, %v643_v24  ;;  %v723_v28 = vpack.c.bf16 %v659_v26, %v659_v26  ;;  %v883_v58 = vpack.c.bf16 %v1715_v14, %v1715_v14 }
  0xb8   :  { %803 = vst.msk [vmem:[%s2491_s2 + $0x94] sm:$0xf] %vm765_vm4, %v738_v23  ;;  %v852_v3 = vpack.c.bf16 %v1727_v18, %v1727_v18 }
  0xb9   :  { %772 = vst.msk [vmem:[%s2491_s2 + $0x18] sm:$0xf] %vm765_vm4, %v707_v27 }
  0xba   :  { %819 = vst.msk [vmem:[%s2491_s2 + $0xd4] sm:$0xf] %vm765_vm4, %v754_v25  ;;  %v1754_v30 = vpop.f32.mrf.mxu2  ;;  %v1756_v31 = vpop.f32.mrf.mxu3 }
  0xbb   :  { %v1758_v32 = vpop.f32.mrf.mxu0  ;;  %788 = vst.msk [vmem:[%s2491_s2 + $0x58] sm:$0xf] %vm765_vm4, %v723_v28  ;;  %vm547_vm14 = vcmp.ge.f32.partialorder %v1754_v30, 0.0  ;;  %v611_v33 = vmul.f32 0.015625, %v1754_v30  ;;  %vm563_vm15 = vcmp.ge.f32.partialorder %v1756_v31, 0.0  ;;  %v627_v34 = vmul.f32 0.015625, %v1756_v31  ;;  %v1768_v35 = vpop.f32.mrf.mxu1 }
  0xbc   :  { %vm516_vm0 = vcmp.ge.f32.partialorder %v1758_v32, 0.0  ;;  %v580_v36 = vmul.f32 0.015625, %v1758_v32  ;;  %vm532_vm1 = vcmp.ge.f32.partialorder %v1768_v35, 0.0  ;;  %v596_v37 = vmul.f32 0.015625, %v1768_v35 }
  0xbd   :  { %v675_v40 = vsel %vm547_vm14, %v1754_v30, %v611_v33  ;;  %v691_v41 = vsel %vm563_vm15, %v1756_v31, %v627_v34  ;;  %v868_v4 = vpack.c.bf16 %v1754_v30, %v1754_v30  ;;  %v884_v5 = vpack.c.bf16 %v1756_v31, %v1756_v31 }
  0xbe   :  { %1062 = vrot.lane.b32.xlu1 %v882_v29, %s1418_s1  ;;  %v644_v42 = vsel %vm516_vm0, %v1758_v32, %v580_v36  ;;  %v739_v43 = vpack.c.bf16 %v675_v40, %v675_v40  ;;  %v755_v44 = vpack.c.bf16 %v691_v41, %v691_v41  ;;  %v660_v45 = vsel %vm532_vm1, %v1768_v35, %v596_v37 }
  0xbf   :  { %968 = vrot.lane.b32.xlu2 %v835_v38, %s1418_s1  ;;  %1000 = vrot.lane.b32.xlu0 %v851_v39, %s1418_s1  ;;  %v708_v46 = vpack.c.bf16 %v644_v42, %v644_v42  ;;  %v724_v47 = vpack.c.bf16 %v660_v45, %v660_v45  ;;  %v837_v22 = vpack.c.bf16 %v1758_v32, %v1758_v32 }
  0xc0   :  { %804 = vst.msk [vmem:[%s2491_s2 + $0x98] sm:$0xf] %vm765_vm4, %v739_v43  ;;  %v853_v31 = vpack.c.bf16 %v1768_v35, %v1768_v35 }
  0xc1   :  { %773 = vst.msk [vmem:[%s2491_s2 + $0x1c] sm:$0xf] %vm765_vm4, %v708_v46 }
  0xc2   :  { %820 = vst.msk [vmem:[%s2491_s2 + $0xd8] sm:$0xf] %vm765_vm4, %v755_v44  ;;  %v1801_v50 = vpop.f32.mrf.mxu2  ;;  %v1803_v51 = vpop.f32.mrf.mxu3 }
  0xc3   :  { %789 = vst.msk [vmem:[%s2491_s2 + $0x5c] sm:$0xf] %vm765_vm4, %v724_v47  ;;  %vm548_vm2 = vcmp.ge.f32.partialorder %v1801_v50, 0.0  ;;  %v612_v52 = vmul.f32 0.015625, %v1801_v50  ;;  %vm564_vm3 = vcmp.ge.f32.partialorder %v1803_v51, 0.0  ;;  %v628_v53 = vmul.f32 0.015625, %v1803_v51  ;;  %v1813_v54 = vpop.f32.mrf.mxu0  ;;  %v1815_v55 = vpop.f32.mrf.mxu1 }
  0xc4   :  { %vm517_vm5 = vcmp.ge.f32.partialorder %v1813_v54, 0.0  ;;  %v581_v56 = vmul.f32 0.015625, %v1813_v54  ;;  %vm533_vm6 = vcmp.ge.f32.partialorder %v1815_v55, 0.0  ;;  %v597_v57 = vmul.f32 0.015625, %v1815_v55 }
  0xc5   :  { %v676_v59 = vsel %vm548_vm2, %v1801_v50, %v612_v52  ;;  %v692_v60 = vsel %vm564_vm3, %v1803_v51, %v628_v53  ;;  %v869_v32 = vpack.c.bf16 %v1801_v50, %v1801_v50  ;;  %v885_v41 = vpack.c.bf16 %v1803_v51, %v1803_v51 }
  0xc6   :  { %1032 = vrot.lane.b32.xlu1 %v867_v48, %s1418_s1  ;;  %v740_v61 = vpack.c.bf16 %v676_v59, %v676_v59  ;;  %v756_v62 = vpack.c.bf16 %v692_v60, %v692_v60  ;;  %v645_v63 = vsel %vm517_vm5, %v1813_v54, %v581_v56  ;;  %v661_v0 = vsel %vm533_vm6, %v1815_v55, %v597_v57 }
  0xc7   :  { %1064 = vrot.lane.b32.xlu2 %v883_v58, %s1418_s1  ;;  %970 = vrot.lane.b32.xlu0 %v836_v49, %s1418_s1  ;;  %v709_v1 = vpack.c.bf16 %v645_v63, %v645_v63  ;;  %v725_v2 = vpack.c.bf16 %v661_v0, %v661_v0  ;;  %v838_v42 = vpack.c.bf16 %v1813_v54, %v1813_v54 }
  0xc8   :  { %805 = vst.msk [vmem:[%s2491_s2 + $0x9c] sm:$0xf] %vm765_vm4, %v740_v61  ;;  %v854_v43 = vpack.c.bf16 %v1815_v55, %v1815_v55 }
  0xc9   :  { %821 = vst.msk [vmem:[%s2491_s2 + $0xdc] sm:$0xf] %vm765_vm4, %v756_v62 }
  0xca   :  { %774 = vst.msk [vmem:[%s2491_s2 + $0x20] sm:$0xf] %vm765_vm4, %v709_v1  ;;  %v1848_v6 = vpop.f32.mrf.mxu2  ;;  %v1850_v7 = vpop.f32.mrf.mxu3 }
  0xcb   :  { %790 = vst.msk [vmem:[%s2491_s2 + $0x60] sm:$0xf] %vm765_vm4, %v725_v2  ;;  %v1856_v8 = vpop.f32.mrf.mxu0  ;;  %v1858_v9 = vpop.f32.mrf.mxu1  ;;  %vm549_vm7 = vcmp.ge.f32.partialorder %v1848_v6, 0.0  ;;  %v613_v10 = vmul.f32 0.015625, %v1848_v6  ;;  %vm565_vm8 = vcmp.ge.f32.partialorder %v1850_v7, 0.0  ;;  %v629_v11 = vmul.f32 0.015625, %v1850_v7 }
  0xcc   :  { %vm518_vm9 = vcmp.ge.f32.partialorder %v1856_v8, 0.0  ;;  %v582_v12 = vmul.f32 0.015625, %v1856_v8  ;;  %vm534_vm10 = vcmp.ge.f32.partialorder %v1858_v9, 0.0  ;;  %v598_v13 = vmul.f32 0.015625, %v1858_v9 }
  0xcd   :  { %v677_v14 = vsel %vm549_vm7, %v1848_v6, %v613_v10  ;;  %v693_v15 = vsel %vm565_vm8, %v1850_v7, %v629_v11  ;;  %v870_v60 = vpack.c.bf16 %v1848_v6, %v1848_v6  ;;  %v886_v61 = vpack.c.bf16 %v1850_v7, %v1850_v7 }
  0xce   :  { %1002 = vrot.lane.b32.xlu1 %v852_v3, %s1418_s1  ;;  %v646_v16 = vsel %vm518_vm9, %v1856_v8, %v582_v12  ;;  %v662_v17 = vsel %vm534_vm10, %v1858_v9, %v598_v13  ;;  %v741_v18 = vpack.c.bf16 %v677_v14, %v677_v14  ;;  %v757_v21 = vpack.c.bf16 %v693_v15, %v693_v15 }
  0xcf   :  { %1034 = vrot.lane.b32.xlu2 %v868_v4, %s1418_s1  ;;  %1066 = vrot.lane.b32.xlu0 %v884_v5, %s1418_s1  ;;  %v710_v19 = vpack.c.bf16 %v646_v16, %v646_v16  ;;  %v726_v20 = vpack.c.bf16 %v662_v17, %v662_v17  ;;  %v839_v6 = vpack.c.bf16 %v1856_v8, %v1856_v8 }
  0xd0   :  { %806 = vst.msk [vmem:[%s2491_s2 + $0xa0] sm:$0xf] %vm765_vm4, %v741_v18  ;;  %v855_v17 = vpack.c.bf16 %v1858_v9, %v1858_v9 }
  0xd1   :  { %775 = vst.msk [vmem:[%s2491_s2 + $0x24] sm:$0xf] %vm765_vm4, %v710_v19 }
  0xd2   :  { %791 = vst.msk [vmem:[%s2491_s2 + $0x64] sm:$0xf] %vm765_vm4, %v726_v20  ;;  %v1889_v23 = vpop.f32.mrf.mxu2  ;;  %v1891_v24 = vpop.f32.mrf.mxu3 }
  0xd3   :  { %822 = vst.msk [vmem:[%s2491_s2 + $0xe0] sm:$0xf] %vm765_vm4, %v757_v21  ;;  %vm550_vm11 = vcmp.ge.f32.partialorder %v1889_v23, 0.0  ;;  %v614_v25 = vmul.f32 0.015625, %v1889_v23  ;;  %vm566_vm12 = vcmp.ge.f32.partialorder %v1891_v24, 0.0  ;;  %v630_v26 = vmul.f32 0.015625, %v1891_v24  ;;  %v1901_v27 = vpop.f32.mrf.mxu0  ;;  %v1903_v28 = vpop.f32.mrf.mxu1 }
  0xd4   :  { %vm519_vm13 = vcmp.ge.f32.partialorder %v1901_v27, 0.0  ;;  %v583_v29 = vmul.f32 0.015625, %v1901_v27  ;;  %vm535_vm14 = vcmp.ge.f32.partialorder %v1903_v28, 0.0  ;;  %v599_v30 = vmul.f32 0.015625, %v1903_v28 }
  0xd5   :  { %v678_v33 = vsel %vm550_vm11, %v1889_v23, %v614_v25  ;;  %v694_v34 = vsel %vm566_vm12, %v1891_v24, %v630_v26 }
  0xd6   :  { %972 = vrot.lane.b32.xlu1 %v837_v22, %s1418_s1  ;;  %v742_v36 = vpack.c.bf16 %v678_v33, %v678_v33  ;;  %v758_v37 = vpack.c.bf16 %v694_v34, %v694_v34  ;;  %v647_v38 = vsel %vm519_vm13, %v1901_v27, %v583_v29  ;;  %v663_v39 = vsel %vm535_vm14, %v1903_v28, %v599_v30 }
  0xd7   :  { %1004 = vrot.lane.b32.xlu2 %v853_v31, %s1418_s1  ;;  %1036 = vrot.lane.b32.xlu0 %v869_v32, %s1418_s1  ;;  %v711_v35 = vpack.c.bf16 %v647_v38, %v647_v38  ;;  %v727_v40 = vpack.c.bf16 %v663_v39, %v663_v39  ;;  %v871_v29 = vpack.c.bf16 %v1889_v23, %v1889_v23 }
  0xd8   :  { %807 = vst.msk [vmem:[%s2491_s2 + $0xa4] sm:$0xf] %vm765_vm4, %v742_v36  ;;  %v887_v30 = vpack.c.bf16 %v1891_v24, %v1891_v24  ;;  %v856_v39 = vpack.c.bf16 %v1903_v28, %v1903_v28 }
  0xd9   :  { %823 = vst.msk [vmem:[%s2491_s2 + $0xe4] sm:$0xf] %vm765_vm4, %v758_v37 }
  0xda   :  { %776 = vst.msk [vmem:[%s2491_s2 + $0x28] sm:$0xf] %vm765_vm4, %v711_v35  ;;  %v1938_v44 = vpop.f32.mrf.mxu2  ;;  %v1940_v45 = vpop.f32.mrf.mxu3  ;;  %v840_v35 = vpack.c.bf16 %v1901_v27, %v1901_v27 }
  0xdb   :  { %792 = vst.msk [vmem:[%s2491_s2 + $0x68] sm:$0xf] %vm765_vm4, %v727_v40  ;;  %vm551_vm15 = vcmp.ge.f32.partialorder %v1938_v44, 0.0  ;;  %v615_v46 = vmul.f32 0.015625, %v1938_v44  ;;  %v1948_v47 = vpop.f32.mrf.mxu0  ;;  %v1950_v48 = vpop.f32.mrf.mxu1  ;;  %vm567_vm0 = vcmp.ge.f32.partialorder %v1940_v45, 0.0  ;;  %v631_v49 = vmul.f32 0.015625, %v1940_v45 }
  0xdc   :  { %vm520_vm1 = vcmp.ge.f32.partialorder %v1948_v47, 0.0  ;;  %v584_v50 = vmul.f32 0.015625, %v1948_v47  ;;  %vm536_vm2 = vcmp.ge.f32.partialorder %v1950_v48, 0.0  ;;  %v600_v51 = vmul.f32 0.015625, %v1950_v48 }
  0xdd   :  { %v679_v52 = vsel %vm551_vm15, %v1938_v44, %v615_v46  ;;  %v695_v53 = vsel %vm567_vm0, %v1940_v45, %v631_v49  ;;  %v872_v40 = vpack.c.bf16 %v1938_v44, %v1938_v44 }
  0xde   :  { %1068 = vrot.lane.b32.xlu1 %v885_v41, %s1418_s1  ;;  %v743_v54 = vpack.c.bf16 %v679_v52, %v679_v52  ;;  %v648_v55 = vsel %vm520_vm1, %v1948_v47, %v584_v50  ;;  %v664_v56 = vsel %vm536_vm2, %v1950_v48, %v600_v51  ;;  %v759_v59 = vpack.c.bf16 %v695_v53, %v695_v53 }
  0xdf   :  { %974 = vrot.lane.b32.xlu2 %v838_v42, %s1418_s1  ;;  %1006 = vrot.lane.b32.xlu0 %v854_v43, %s1418_s1  ;;  %v712_v57 = vpack.c.bf16 %v648_v55, %v648_v55  ;;  %v728_v58 = vpack.c.bf16 %v664_v56, %v664_v56 }
  0xe0   :  { %808 = vst.msk [vmem:[%s2491_s2 + $0xa8] sm:$0xf] %vm765_vm4, %v743_v54 }
  0xe1   :  { %777 = vst.msk [vmem:[%s2491_s2 + $0x2c] sm:$0xf] %vm765_vm4, %v712_v57 }
  0xe2   :  { %793 = vst.msk [vmem:[%s2491_s2 + $0x6c] sm:$0xf] %vm765_vm4, %v728_v58  ;;  %v1981_v62 = vpop.f32.mrf.mxu2  ;;  %v1983_v63 = vpop.f32.mrf.mxu3 }
  0xe3   :  { %vm552_vm3 = vcmp.ge.f32.partialorder %v1981_v62, 0.0  ;;  %v616_v0 = vmul.f32 0.015625, %v1981_v62  ;;  %824 = vst.msk [vmem:[%s2491_s2 + $0xe8] sm:$0xf] %vm765_vm4, %v759_v59  ;;  %v1991_v1 = vpop.f32.mrf.mxu0  ;;  %vm568_vm5 = vcmp.ge.f32.partialorder %v1983_v63, 0.0  ;;  %v632_v2 = vmul.f32 0.015625, %v1983_v63  ;;  %v1995_v3 = vpop.f32.mrf.mxu1 }
  0xe4   :  { %vm521_vm6 = vcmp.ge.f32.partialorder %v1991_v1, 0.0  ;;  %v585_v4 = vmul.f32 0.015625, %v1991_v1  ;;  %vm537_vm7 = vcmp.ge.f32.partialorder %v1995_v3, 0.0  ;;  %v601_v5 = vmul.f32 0.015625, %v1995_v3 }
  0xe5   :  { %v680_v7 = vsel %vm552_vm3, %v1981_v62, %v616_v0  ;;  %v696_v10 = vsel %vm568_vm5, %v1983_v63, %v632_v2  ;;  %v888_v59 = vpack.c.bf16 %v1940_v45, %v1940_v45 }
  0xe6   :  { %1038 = vrot.lane.b32.xlu1 %v870_v60, %s1418_s1  ;;  %v744_v11 = vpack.c.bf16 %v680_v7, %v680_v7  ;;  %v649_v12 = vsel %vm521_vm6, %v1991_v1, %v585_v4  ;;  %v665_v13 = vsel %vm537_vm7, %v1995_v3, %v601_v5  ;;  %v760_v15 = vpack.c.bf16 %v696_v10, %v696_v10 }
  0xe7   :  { %1070 = vrot.lane.b32.xlu2 %v886_v61, %s1418_s1  ;;  %976 = vrot.lane.b32.xlu0 %v839_v6, %s1418_s1  ;;  %v713_v14 = vpack.c.bf16 %v649_v12, %v649_v12  ;;  %v729_v8 = vpack.c.bf16 %v665_v13, %v665_v13  ;;  %v841_v4 = vpack.c.bf16 %v1948_v47, %v1948_v47 }
  0xe8   :  { %809 = vst.msk [vmem:[%s2491_s2 + $0xac] sm:$0xf] %vm765_vm4, %v744_v11  ;;  %v857_v6 = vpack.c.bf16 %v1950_v48, %v1950_v48 }
  0xe9   :  { %v1023_v16 = vpop.permute.xlu2 %1022  ;;  %778 = vst.msk [vmem:[%s2491_s2 + $0x30] sm:$0xf] %vm765_vm4, %v713_v14 }
  0xea   :  { %1182 = vst.msk [vmem:[%s2492_s3 + $0x80] sm:$0xf] %vm765_vm4, %v1023_v16  ;;  %v2024_v18 = vpop.f32.mrf.mxu2  ;;  %v2026_v19 = vpop.f32.mrf.mxu3 }
  0xeb   :  { %825 = vst.msk [vmem:[%s2491_s2 + $0xec] sm:$0xf] %vm765_vm4, %v760_v15  ;;  %v2032_v20 = vpop.f32.mrf.mxu0  ;;  %vm553_vm8 = vcmp.ge.f32.partialorder %v2024_v18, 0.0  ;;  %v617_v21 = vmul.f32 0.015625, %v2024_v18  ;;  %vm569_vm9 = vcmp.ge.f32.partialorder %v2026_v19, 0.0  ;;  %v633_v22 = vmul.f32 0.015625, %v2026_v19  ;;  %v2038_v9 = vpop.f32.mrf.mxu1 }
  0xec   :  { %vm522_vm10 = vcmp.ge.f32.partialorder %v2032_v20, 0.0  ;;  %v586_v25 = vmul.f32 0.015625, %v2032_v20  ;;  %794 = vst.msk [vmem:[%s2491_s2 + $0x70] sm:$0xf] %vm765_vm4, %v729_v8  ;;  %vm538_vm11 = vcmp.ge.f32.partialorder %v2038_v9, 0.0  ;;  %v602_v26 = vmul.f32 0.015625, %v2038_v9 }
  0xed   :  { %v681_v31 = vsel %vm553_vm8, %v2024_v18, %v617_v21  ;;  %v697_v32 = vsel %vm569_vm9, %v2026_v19, %v633_v22 }
  0xee   :  { %1008 = vrot.lane.b32.xlu1 %v855_v17, %s1418_s1  ;;  %v650_v33 = vsel %vm522_vm10, %v2032_v20, %v586_v25  ;;  %v745_v34 = vpack.c.bf16 %v681_v31, %v681_v31  ;;  %v666_v36 = vsel %vm538_vm11, %v2038_v9, %v602_v26  ;;  %v761_v23 = vpack.c.bf16 %v697_v32, %v697_v32 }
  0xef   :  { %1040 = vrot.lane.b32.xlu2 %v871_v29, %s1418_s1  ;;  %1072 = vrot.lane.b32.xlu0 %v887_v30, %s1418_s1  ;;  %v714_v37 = vpack.c.bf16 %v650_v33, %v650_v33  ;;  %v730_v24 = vpack.c.bf16 %v666_v36, %v666_v36  ;;  %v842_v26 = vpack.c.bf16 %v1991_v1, %v1991_v1 }
  0xf0   :  { %810 = vst.msk [vmem:[%s2491_s2 + $0xb0] sm:$0xf] %vm765_vm4, %v745_v34  ;;  %v873_v30 = vpack.c.bf16 %v1981_v62, %v1981_v62  ;;  %v889_v32 = vpack.c.bf16 %v1983_v63, %v1983_v63 }
  0xf1   :  { %v993_v38 = vpop.permute.xlu2 %992  ;;  %779 = vst.msk [vmem:[%s2491_s2 + $0x34] sm:$0xf] %vm765_vm4, %v714_v37 }
  0xf2   :  { %1167 = vst.msk [vmem:[%s2492_s3 + $0x44] sm:$0xf] %vm765_vm4, %v993_v38  ;;  %v2077_v41 = vpop.f32.mrf.mxu2  ;;  %v2079_v42 = vpop.f32.mrf.mxu3  ;;  %v874_v38 = vpack.c.bf16 %v2024_v18, %v2024_v18 }
  0xf3   :  { %826 = vst.msk [vmem:[%s2491_s2 + $0xf0] sm:$0xf] %vm765_vm4, %v761_v23  ;;  %vm554_vm12 = vcmp.ge.f32.partialorder %v2077_v41, 0.0  ;;  %v618_v43 = vmul.f32 0.015625, %v2077_v41  ;;  %vm570_vm13 = vcmp.ge.f32.partialorder %v2079_v42, 0.0  ;;  %v634_v27 = vmul.f32 0.015625, %v2079_v42  ;;  %v2093_v28 = vpop.f32.mrf.mxu1  ;;  %v2097_v49 = vpop.f32.mrf.mxu0 }
  0xf4   :  { %795 = vst.msk [vmem:[%s2491_s2 + $0x74] sm:$0xf] %vm765_vm4, %v730_v24  ;;  %vm539_vm14 = vcmp.ge.f32.partialorder %v2093_v28, 0.0  ;;  %v603_v50 = vmul.f32 0.015625, %v2093_v28  ;;  %vm523_vm15 = vcmp.ge.f32.partialorder %v2097_v49, 0.0  ;;  %v587_v53 = vmul.f32 0.015625, %v2097_v49 }
  0xf5   :  { %v682_v44 = vsel %vm554_vm12, %v2077_v41, %v618_v43  ;;  %v698_v46 = vsel %vm570_vm13, %v2079_v42, %v634_v27  ;;  %v858_v24 = vpack.c.bf16 %v1995_v3, %v1995_v3  ;;  %v875_v43 = vpack.c.bf16 %v2077_v41, %v2077_v41 }
  0xf6   :  { %978 = vrot.lane.b32.xlu1 %v840_v35, %s1418_s1  ;;  %v746_v51 = vpack.c.bf16 %v682_v44, %v682_v44  ;;  %v762_v52 = vpack.c.bf16 %v698_v46, %v698_v46  ;;  %v667_v54 = vsel %vm539_vm14, %v2093_v28, %v603_v50  ;;  %v651_v55 = vsel %vm523_vm15, %v2097_v49, %v587_v53 }
  0xf7   :  { %1010 = vrot.lane.b32.xlu2 %v856_v39, %s1418_s1  ;;  %1042 = vrot.lane.b32.xlu0 %v872_v40, %s1418_s1  ;;  %v715_v58 = vpack.c.bf16 %v651_v55, %v651_v55  ;;  %v731_v60 = vpack.c.bf16 %v667_v54, %v667_v54  ;;  %v890_v39 = vpack.c.bf16 %v2026_v19, %v2026_v19 }
  0xf8   :  { %811 = vst.msk [vmem:[%s2491_s2 + $0xb4] sm:$0xf] %vm765_vm4, %v746_v51  ;;  %v843_v19 = vpack.c.bf16 %v2032_v20, %v2032_v20  ;;  %v859_v40 = vpack.c.bf16 %v2038_v9, %v2038_v9  ;;  %v844_v41 = vpack.c.bf16 %v2097_v49, %v2097_v49  ;;  %v860_v46 = vpack.c.bf16 %v2093_v28, %v2093_v28 }
  0xf9   :  { %v1059_v56 = vpop.permute.xlu2 %1058  ;;  %v959_v57 = vpop.permute.xlu0 %958  ;;  %827 = vst.msk [vmem:[%s2491_s2 + $0xf4] sm:$0xf] %vm765_vm4, %v762_v52 }
  0xfa   :  { %1200 = vst.msk [vmem:[%s2492_s3 + $0xc8] sm:$0xf] %vm765_vm4, %v1059_v56  ;;  %v2122_v61 = vpop.f32.mrf.mxu2  ;;  %v991_v0 = vpop.permute.xlu1 %990 }
  0xfb   :  { %1150 = vst.msk [vmem:[%s2492_s3] sm:$0xf] %vm765_vm4, %v959_v57  ;;  %vm555_vm0 = vcmp.ge.f32.partialorder %v2122_v61, 0.0  ;;  %v619_v2 = vmul.f32 0.015625, %v2122_v61  ;;  %v2136_v45 = vpop.f32.mrf.mxu1  ;;  %v2138_v5 = vpop.f32.mrf.mxu3  ;;  %v876_v9 = vpack.c.bf16 %v2122_v61, %v2122_v61  ;;  %v891_v57 = vpack.c.bf16 %v2079_v42, %v2079_v42 }
  0xfc   :  { %1166 = vst.msk [vmem:[%s2492_s3 + $0x40] sm:$0xf] %vm765_vm4, %v991_v0  ;;  %v2147_v47 = vpop.f32.mrf.mxu0  ;;  %vm540_vm1 = vcmp.ge.f32.partialorder %v2136_v45, 0.0  ;;  %v604_v10 = vmul.f32 0.015625, %v2136_v45  ;;  %vm571_vm3 = vcmp.ge.f32.partialorder %v2138_v5, 0.0  ;;  %v635_v13 = vmul.f32 0.015625, %v2138_v5 }
  0xfd   :  { %780 = vst.msk [vmem:[%s2491_s2 + $0x38] sm:$0xf] %vm765_vm4, %v715_v58  ;;  %v683_v7 = vsel %vm555_vm0, %v2122_v61, %v619_v2  ;;  %vm524_vm2 = vcmp.ge.f32.partialorder %v2147_v47, 0.0  ;;  %v588_v11 = vmul.f32 0.015625, %v2147_v47  ;;  %v861_v28 = vpack.c.bf16 %v2136_v45, %v2136_v45 }
  0xfe   :  { %1074 = vrot.lane.b32.xlu1 %v888_v59, %s1418_s1  ;;  %796 = vst.msk [vmem:[%s2491_s2 + $0x78] sm:$0xf] %vm765_vm4, %v731_v60  ;;  %v747_v48 = vpack.c.bf16 %v683_v7, %v683_v7  ;;  %v668_v12 = vsel %vm540_vm1, %v2136_v45, %v604_v10  ;;  %v699_v21 = vsel %vm571_vm3, %v2138_v5, %v635_v13 }
  0xff   :  { %980 = vrot.lane.b32.xlu2 %v841_v4, %s1418_s1  ;;  %1012 = vrot.lane.b32.xlu0 %v857_v6, %s1418_s1  ;;  %v652_v14 = vsel %vm524_vm2, %v2147_v47, %v588_v11  ;;  %v732_v17 = vpack.c.bf16 %v668_v12, %v668_v12  ;;  %v763_v25 = vpack.c.bf16 %v699_v21, %v699_v21 }
 0x100   :  { %812 = vst.msk [vmem:[%s2491_s2 + $0xb8] sm:$0xf] %vm765_vm4, %v747_v48  ;;  %v716_v16 = vpack.c.bf16 %v652_v14, %v652_v14  ;;  %v845_v49 = vpack.c.bf16 %v2147_v47, %v2147_v47  ;;  %v892_v59 = vpack.c.bf16 %v2138_v5, %v2138_v5 }
 0x101   :  { %v1029_v15 = vpop.permute.xlu2 %1028  ;;  %v1055_v8 = vpop.permute.xlu0 %1054  ;;  %797 = vst.msk [vmem:[%s2491_s2 + $0x7c] sm:$0xf] %vm765_vm4, %v732_v17 }
 0x102   :  { %1185 = vst.msk [vmem:[%s2492_s3 + $0x8c] sm:$0xf] %vm765_vm4, %v1029_v15  ;;  %v2173_v22 = vpop.f32.mrf.mxu2 }
 0x103   :  { %1198 = vst.msk [vmem:[%s2492_s3 + $0xc0] sm:$0xf] %vm765_vm4, %v1055_v8  ;;  %vm556_vm5 = vcmp.ge.f32.partialorder %v2173_v22, 0.0  ;;  %v620_v29 = vmul.f32 0.015625, %v2173_v22  ;;  %v2189_v31 = vpop.f32.mrf.mxu3  ;;  %v877_v53 = vpack.c.bf16 %v2173_v22, %v2173_v22 }
 0x104   :  { %781 = vst.msk [vmem:[%s2491_s2 + $0x3c] sm:$0xf] %vm765_vm4, %v716_v16  ;;  %vm572_vm6 = vcmp.ge.f32.partialorder %v2189_v31, 0.0  ;;  %v636_v62 = vmul.f32 0.015625, %v2189_v31  ;;  %v893_v58 = vpack.c.bf16 %v2189_v31, %v2189_v31 }
 0x105   :  { %v684_v1 = vsel %vm556_vm5, %v2173_v22, %v620_v29  ;;  %828 = vst.msk [vmem:[%s2491_s2 + $0xf8] sm:$0xf] %vm765_vm4, %v763_v25 }
 0x106   :  { %1044 = vrot.lane.b32.xlu1 %v873_v30, %s1418_s1  ;;  %v748_v33 = vpack.c.bf16 %v684_v1, %v684_v1  ;;  %v700_v63 = vsel %vm572_vm6, %v2189_v31, %v636_v62 }
 0x107   :  { %1076 = vrot.lane.b32.xlu2 %v889_v32, %s1418_s1  ;;  %982 = vrot.lane.b32.xlu0 %v842_v26, %s1418_s1  ;;  %v764_v36 = vpack.c.bf16 %v700_v63, %v700_v63 }
 0x108   :  { %v1057_v34 = vpop.permute.xlu1 %1056  ;;  %813 = vst.msk [vmem:[%s2491_s2 + $0xbc] sm:$0xf] %vm765_vm4, %v748_v33 }
 0x109   :  { %1199 = vst.msk [vmem:[%s2492_s3 + $0xc4] sm:$0xf] %vm765_vm4, %v1057_v34  ;;  %v967_v37 = vpop.permute.xlu2 %966  ;;  %v961_v23 = vpop.permute.xlu0 %960 }
 0x10a   :  { %1154 = vst.msk [vmem:[%s2492_s3 + $0x10] sm:$0xf] %vm765_vm4, %v967_v37 }
 0x10b   :  { %1151 = vst.msk [vmem:[%s2492_s3 + $0x4] sm:$0xf] %vm765_vm4, %v961_v23 }
 0x10c   :  { %829 = vst.msk [vmem:[%s2491_s2 + $0xfc] sm:$0xf] %vm765_vm4, %v764_v36 }
 0x10e   :  { %1014 = vrot.lane.b32.xlu1 %v858_v24, %s1418_s1 }
 0x10f   :  { %1046 = vrot.lane.b32.xlu2 %v874_v38, %s1418_s1  ;;  %1078 = vrot.lane.b32.xlu0 %v890_v39, %s1418_s1 }
 0x110   :  { %v963_v3 = vpop.permute.xlu1 %962 }
 0x111   :  { %1152 = vst.msk [vmem:[%s2492_s3 + $0x8] sm:$0xf] %vm765_vm4, %v963_v3  ;;  %v999_v18 = vpop.permute.xlu2 %998  ;;  %v1025_v35 = vpop.permute.xlu0 %1024 }
 0x112   :  { %1170 = vst.msk [vmem:[%s2492_s3 + $0x50] sm:$0xf] %vm765_vm4, %v999_v18 }
 0x113   :  { %1183 = vst.msk [vmem:[%s2492_s3 + $0x84] sm:$0xf] %vm765_vm4, %v1025_v35 }
 0x116   :  { %984 = vrot.lane.b32.xlu1 %v843_v19, %s1418_s1 }
 0x117   :  { %1016 = vrot.lane.b32.xlu2 %v859_v40, %s1418_s1  ;;  %1048 = vrot.lane.b32.xlu0 %v875_v43, %s1418_s1 }
 0x118   :  { %v1027_v27 = vpop.permute.xlu1 %1026 }
 0x119   :  { %1184 = vst.msk [vmem:[%s2492_s3 + $0x88] sm:$0xf] %vm765_vm4, %v1027_v27  ;;  %v969_v44 = vpop.permute.xlu2 %968  ;;  %v995_v20 = vpop.permute.xlu0 %994 }
 0x11a   :  { %1155 = vst.msk [vmem:[%s2492_s3 + $0x14] sm:$0xf] %vm765_vm4, %v969_v44 }
 0x11b   :  { %1168 = vst.msk [vmem:[%s2492_s3 + $0x48] sm:$0xf] %vm765_vm4, %v995_v20 }
 0x11e   :  { %1050 = vrot.lane.b32.xlu1 %v876_v9, %s1418_s1 }
 0x11f   :  { %986 = vrot.lane.b32.xlu2 %v844_v41, %s1418_s1  ;;  %1018 = vrot.lane.b32.xlu0 %v860_v46, %s1418_s1 }
 0x120   :  { %v965_v50 = vpop.permute.xlu1 %964 }
 0x121   :  { %1153 = vst.msk [vmem:[%s2492_s3 + $0xc] sm:$0xf] %vm765_vm4, %v965_v50  ;;  %v1065_v51 = vpop.permute.xlu2 %1064  ;;  %v1061_v52 = vpop.permute.xlu0 %1060 }
 0x122   :  { %1203 = vst.msk [vmem:[%s2492_s3 + $0xd4] sm:$0xf] %vm765_vm4, %v1065_v51 }
 0x123   :  { %1201 = vst.msk [vmem:[%s2492_s3 + $0xcc] sm:$0xf] %vm765_vm4, %v1061_v52 }
 0x126   :  { %1020 = vrot.lane.b32.xlu1 %v861_v28, %s1418_s1 }
 0x127   :  { %1052 = vrot.lane.b32.xlu2 %v877_v53, %s1418_s1  ;;  %988 = vrot.lane.b32.xlu0 %v845_v49, %s1418_s1 }
 0x128   :  { %v997_v54 = vpop.permute.xlu1 %996 }
 0x129   :  { %1169 = vst.msk [vmem:[%s2492_s3 + $0x4c] sm:$0xf] %vm765_vm4, %v997_v54  ;;  %v1035_v55 = vpop.permute.xlu2 %1034  ;;  %v1031_v56 = vpop.permute.xlu0 %1030 }
 0x12a   :  { %1188 = vst.msk [vmem:[%s2492_s3 + $0x98] sm:$0xf] %vm765_vm4, %v1035_v55 }
 0x12b   :  { %1186 = vst.msk [vmem:[%s2492_s3 + $0x90] sm:$0xf] %vm765_vm4, %v1031_v56 }
 0x12e   :  { %1080 = vrot.lane.b32.xlu1 %v891_v57, %s1418_s1 }
 0x12f   :  { %1082 = vrot.lane.b32.xlu2 %v892_v59, %s1418_s1  ;;  %1084 = vrot.lane.b32.xlu0 %v893_v58, %s1418_s1 }
 0x130   :  { %v1063_v60 = vpop.permute.xlu1 %1062 }
 0x131   :  { %1202 = vst.msk [vmem:[%s2492_s3 + $0xd0] sm:$0xf] %vm765_vm4, %v1063_v60  ;;  %v1005_v61 = vpop.permute.xlu2 %1004  ;;  %v1001_v42 = vpop.permute.xlu0 %1000 }
 0x132   :  { %1173 = vst.msk [vmem:[%s2492_s3 + $0x5c] sm:$0xf] %vm765_vm4, %v1005_v61 }
 0x133   :  { %1171 = vst.msk [vmem:[%s2492_s3 + $0x54] sm:$0xf] %vm765_vm4, %v1001_v42 }
 0x138   :  { %v1033_v0 = vpop.permute.xlu1 %1032 }
 0x139   :  { %1187 = vst.msk [vmem:[%s2492_s3 + $0x94] sm:$0xf] %vm765_vm4, %v1033_v0  ;;  %v975_v2 = vpop.permute.xlu2 %974  ;;  %v971_v4 = vpop.permute.xlu0 %970 }
 0x13a   :  { %1158 = vst.msk [vmem:[%s2492_s3 + $0x20] sm:$0xf] %vm765_vm4, %v975_v2 }
 0x13b   :  { %1156 = vst.msk [vmem:[%s2492_s3 + $0x18] sm:$0xf] %vm765_vm4, %v971_v4 }
 0x140   :  { %v1003_v45 = vpop.permute.xlu1 %1002 }
 0x141   :  { %1172 = vst.msk [vmem:[%s2492_s3 + $0x58] sm:$0xf] %vm765_vm4, %v1003_v45  ;;  %v1071_v5 = vpop.permute.xlu2 %1070  ;;  %v1067_v6 = vpop.permute.xlu0 %1066 }
 0x142   :  { %1206 = vst.msk [vmem:[%s2492_s3 + $0xe0] sm:$0xf] %vm765_vm4, %v1071_v5 }
 0x143   :  { %1204 = vst.msk [vmem:[%s2492_s3 + $0xd8] sm:$0xf] %vm765_vm4, %v1067_v6 }
 0x148   :  { %v973_v7 = vpop.permute.xlu1 %972 }
 0x149   :  { %1157 = vst.msk [vmem:[%s2492_s3 + $0x1c] sm:$0xf] %vm765_vm4, %v973_v7  ;;  %v1041_v47 = vpop.permute.xlu2 %1040  ;;  %v1037_v10 = vpop.permute.xlu0 %1036 }
 0x14a   :  { %1191 = vst.msk [vmem:[%s2492_s3 + $0xa4] sm:$0xf] %vm765_vm4, %v1041_v47 }
 0x14b   :  { %1189 = vst.msk [vmem:[%s2492_s3 + $0x9c] sm:$0xf] %vm765_vm4, %v1037_v10 }
 0x150   :  { %v1069_v48 = vpop.permute.xlu1 %1068 }
 0x151   :  { %1205 = vst.msk [vmem:[%s2492_s3 + $0xdc] sm:$0xf] %vm765_vm4, %v1069_v48  ;;  %v1011_v11 = vpop.permute.xlu2 %1010  ;;  %v1007_v12 = vpop.permute.xlu0 %1006 }
 0x152   :  { %1176 = vst.msk [vmem:[%s2492_s3 + $0x68] sm:$0xf] %vm765_vm4, %v1011_v11 }
 0x153   :  { %1174 = vst.msk [vmem:[%s2492_s3 + $0x60] sm:$0xf] %vm765_vm4, %v1007_v12 }
 0x158   :  { %v1039_v13 = vpop.permute.xlu1 %1038 }
 0x159   :  { %1190 = vst.msk [vmem:[%s2492_s3 + $0xa0] sm:$0xf] %vm765_vm4, %v1039_v13  ;;  %v981_v14 = vpop.permute.xlu2 %980  ;;  %v977_v15 = vpop.permute.xlu0 %976 }
 0x15a   :  { %1161 = vst.msk [vmem:[%s2492_s3 + $0x2c] sm:$0xf] %vm765_vm4, %v981_v14 }
 0x15b   :  { %1159 = vst.msk [vmem:[%s2492_s3 + $0x24] sm:$0xf] %vm765_vm4, %v977_v15 }
 0x160   :  { %v1009_v8 = vpop.permute.xlu1 %1008 }
 0x161   :  { %1175 = vst.msk [vmem:[%s2492_s3 + $0x64] sm:$0xf] %vm765_vm4, %v1009_v8  ;;  %v1077_v16 = vpop.permute.xlu2 %1076  ;;  %v1073_v17 = vpop.permute.xlu0 %1072 }
 0x162   :  { %1209 = vst.msk [vmem:[%s2492_s3 + $0xec] sm:$0xf] %vm765_vm4, %v1077_v16 }
 0x163   :  { %1207 = vst.msk [vmem:[%s2492_s3 + $0xe4] sm:$0xf] %vm765_vm4, %v1073_v17 }
 0x168   :  { %v979_v21 = vpop.permute.xlu1 %978 }
 0x169   :  { %1160 = vst.msk [vmem:[%s2492_s3 + $0x28] sm:$0xf] %vm765_vm4, %v979_v21  ;;  %v1047_v22 = vpop.permute.xlu2 %1046  ;;  %v1043_v25 = vpop.permute.xlu0 %1042 }
 0x16a   :  { %1194 = vst.msk [vmem:[%s2492_s3 + $0xb0] sm:$0xf] %vm765_vm4, %v1047_v22 }
 0x16b   :  { %1192 = vst.msk [vmem:[%s2492_s3 + $0xa8] sm:$0xf] %vm765_vm4, %v1043_v25 }
 0x170   :  { %v1075_v26 = vpop.permute.xlu1 %1074 }
 0x171   :  { %1208 = vst.msk [vmem:[%s2492_s3 + $0xe8] sm:$0xf] %vm765_vm4, %v1075_v26  ;;  %v1017_v29 = vpop.permute.xlu2 %1016  ;;  %v1013_v30 = vpop.permute.xlu0 %1012 }
 0x172   :  { %1179 = vst.msk [vmem:[%s2492_s3 + $0x74] sm:$0xf] %vm765_vm4, %v1017_v29 }
 0x173   :  { %1177 = vst.msk [vmem:[%s2492_s3 + $0x6c] sm:$0xf] %vm765_vm4, %v1013_v30 }
 0x178   :  { %v1045_v31 = vpop.permute.xlu1 %1044 }
 0x179   :  { %1193 = vst.msk [vmem:[%s2492_s3 + $0xac] sm:$0xf] %vm765_vm4, %v1045_v31  ;;  %v987_v32 = vpop.permute.xlu2 %986  ;;  %v983_v1 = vpop.permute.xlu0 %982 }
 0x17a   :  { %1164 = vst.msk [vmem:[%s2492_s3 + $0x38] sm:$0xf] %vm765_vm4, %v987_v32 }
 0x17b   :  { %1162 = vst.msk [vmem:[%s2492_s3 + $0x30] sm:$0xf] %vm765_vm4, %v983_v1 }
 0x180   :  { %v1015_v62 = vpop.permute.xlu1 %1014 }
 0x181   :  { %1178 = vst.msk [vmem:[%s2492_s3 + $0x70] sm:$0xf] %vm765_vm4, %v1015_v62  ;;  %v1053_v33 = vpop.permute.xlu2 %1052  ;;  %v1079_v63 = vpop.permute.xlu0 %1078 }
 0x182   :  { %1197 = vst.msk [vmem:[%s2492_s3 + $0xbc] sm:$0xf] %vm765_vm4, %v1053_v33 }
 0x183   :  { %1210 = vst.msk [vmem:[%s2492_s3 + $0xf0] sm:$0xf] %vm765_vm4, %v1079_v63 }
 0x188   :  { %v985_v34 = vpop.permute.xlu1 %984 }
 0x189   :  { %1163 = vst.msk [vmem:[%s2492_s3 + $0x34] sm:$0xf] %vm765_vm4, %v985_v34  ;;  %v1083_v36 = vpop.permute.xlu2 %1082  ;;  %v1049_v37 = vpop.permute.xlu0 %1048 }
 0x18a   :  { %1212 = vst.msk [vmem:[%s2492_s3 + $0xf8] sm:$0xf] %vm765_vm4, %v1083_v36 }
 0x18b   :  { %1195 = vst.msk [vmem:[%s2492_s3 + $0xb4] sm:$0xf] %vm765_vm4, %v1049_v37 }
 0x190   :  { %v1051_v23 = vpop.permute.xlu1 %1050 }
 0x191   :  { %1196 = vst.msk [vmem:[%s2492_s3 + $0xb8] sm:$0xf] %vm765_vm4, %v1051_v23  ;;  %v1019_v24 = vpop.permute.xlu0 %1018 }
 0x192   :  { %1180 = vst.msk [vmem:[%s2492_s3 + $0x78] sm:$0xf] %vm765_vm4, %v1019_v24 }
 0x198   :  { %v1021_v38 = vpop.permute.xlu1 %1020 }
 0x199   :  { %1181 = vst.msk [vmem:[%s2492_s3 + $0x7c] sm:$0xf] %vm765_vm4, %v1021_v38  ;;  %v989_v39 = vpop.permute.xlu0 %988 }
 0x19a   :  { %1165 = vst.msk [vmem:[%s2492_s3 + $0x3c] sm:$0xf] %vm765_vm4, %v989_v39 }
 0x1a0   :  { %v1081_v3 = vpop.permute.xlu1 %1080 }
 0x1a1   :  { %1211 = vst.msk [vmem:[%s2492_s3 + $0xf4] sm:$0xf] %vm765_vm4, %v1081_v3  ;;  %v1085_v18 = vpop.permute.xlu0 %1084 }
 0x1a2   :  { %1213 = vst.msk [vmem:[%s2492_s3 + $0xfc] sm:$0xf] %vm765_vm4, %v1085_v18 }

</bundles_post_ra>
